<compile_context>
chip_gen: v5e
topology: v5e:2x2
jax: 0.10.0
libtpu: 0.0.40
codegen_flags: <defaults>
</compile_context>

<pallas_src>
import math
from functools import partial

import jax
import jax.numpy as jnp
from jax.experimental import pallas as pl
from jax.experimental.pallas import tpu as pltpu


def _round_up(n, m):
    return ((n + m - 1) // m) * m


def convkb_kernel(x_ref, w_ref, cb_ref, fw_ref, fb_ref, o_ref):
    # x_ref : (B_T, L*D)    VMEM  batch rows on sublanes, k = l*D + d on lanes
    # w_ref : (L*D, OC*D)   VMEM  conv weight folded into a dense GEMM operand
    #                             (compute dtype, typically bf16), resident
    # cb_ref: (1, OC*D)     VMEM  conv bias repeated over d (oc-major), f32
    # fw_ref: (OC*D, 1)     VMEM  fc weight column (compute dtype), resident
    # fb_ref: (1,)          SMEM  fc bias scalar
    # o_ref : (B_T, 1)      VMEM  per-tile output block
    compute_dtype = w_ref.dtype

    # In-kernel cast (f32 HBM -> bf16 MXU operand): cheap VPU work hidden under
    # the x DMA; avoids f32 MXU emulation (critical on v5e).  If x already
    # arrives in the compute dtype this is a no-op.
    x = x_ref[...].astype(compute_dtype)

    # Conv2d(1, OC, (1, L)) recast as a single MXU GEMM (K = L*D, N = OC*D)
    # that directly produces the flattened, oc-major (B_T, OC*D) slab.
    conv = jnp.dot(x, w_ref[...], preferred_element_type=jnp.float32)

    # bias + ReLU in f32 (dropout = identity in eval mode).
    act = jnp.maximum(conv + cb_ref[...], 0.0)

    # fc layer as a second (tiny) MXU matmul -> keeps the reduction off the
    # XLU and yields the (B_T, 1) output block directly.
    out = jnp.dot(act.astype(compute_dtype), fw_ref[...],
                  preferred_element_type=jnp.float32)          # (B_T, 1)

    o_ref[...] = (out + fb_ref[0]).astype(o_ref.dtype)


def prepare_convkb_params(conv_w, conv_b, fc_w, fc_b, *,
                          compute_dtype=jnp.bfloat16):
    """One-time folding of the module weights into kernel operands.

    conv_w: (OC, 1, 1, L); conv_b: (OC,); fc_w: (1, OC*D); fc_b: (1,).
    Returns (w_mat(K,F), cb_row(1,F), fw_col(F,1), fb(1,)).
    """
    OC, _, _, L = conv_w.shape
    F = fc_w.shape[1]
    D = F // OC
    K = L * D

    cw = conv_w.reshape(OC, L).astype(jnp.float32)              # (OC, L)
    eye_d = jnp.eye(D, dtype=jnp.float32)
    # W[l*D + d', oc*D + d] = cw[oc, l] * (d' == d)
    w_mat = (cw.T[:, None, :, None] * eye_d[None, :, None, :]).reshape(K, F)
    w_mat = w_mat.astype(compute_dtype)
    cb_row = jnp.repeat(conv_b.astype(jnp.float32), D).reshape(1, F)   # f32 bias
    fw_col = fc_w.reshape(F, 1).astype(compute_dtype)           # == fc_w.T, oc-major
    fb_sc = fc_b.reshape(1).astype(jnp.float32)                 # scalar -> SMEM
    return w_mat, cb_row, fw_col, fb_sc


@partial(jax.jit, static_argnames=("batch_tile",))
def convkb_forward(x, params, batch_tile=8192):
    """x: (B, L, D) any float dtype; params from prepare_convkb_params.
       Returns (B, 1) float32."""
    w_mat, cb_row, fw_col, fb_sc = params
    B, L, D = x.shape
    K, F = w_mat.shape
    assert K == L * D

    # Batch tiling: no padding — ragged last tile reads garbage rows whose
    # outputs are out-of-bounds in the output block and therefore dropped.
    bt = min(batch_tile, _round_up(B, 8))                       # multiple of 8 sublanes
    num_tiles = pl.cdiv(B, bt)

    x2 = x.reshape(B, K)                                        # free reshape, k = l*D + d

    out = pl.pallas_call(
        convkb_kernel,
        out_shape=jax.ShapeDtypeStruct((B, 1), jnp.float32),
        grid=(num_tiles,),
        in_specs=[
            pl.BlockSpec((bt, K), lambda i: (i, 0)),            # x: batch-tiled, pipelined
            pl.BlockSpec((K, F), lambda i: (0, 0)),             # folded conv weight: resident
            pl.BlockSpec((1, F), lambda i: (0, 0)),             # conv bias row: resident
            pl.BlockSpec((F, 1), lambda i: (0, 0)),             # fc weight column: resident
            pl.BlockSpec(memory_space=pltpu.MemorySpace.SMEM),  # fc bias scalar
        ],
        out_specs=pl.BlockSpec((bt, 1), lambda i: (i, 0)),      # (bt,1) tile; tail rows dropped
        compiler_params=pltpu.CompilerParams(
            dimension_semantics=("parallel",),                  # megacore sharding
            vmem_limit_bytes=48 * 1024 * 1024,                  # 2x8 MiB x-buffers + slack
        ),
    )(x2, w_mat, cb_row, fw_col, fb_sc)

    return out


def xavier_uniform(key, shape, fan_in, fan_out, gain):
    bound = gain * math.sqrt(6.0 / (fan_in + fan_out))
    return jax.random.uniform(key, shape, jnp.float32, -bound, bound)


def reference_forward(x, conv_w, conv_b, fc_w, fc_b):
    B, L, D = x.shape
    OC = conv_w.shape[0]
    cw = conv_w.reshape(OC, L)
    conv = jnp.einsum("ol,bld->bod", cw, x) + conv_b[None, :, None]
    act = jnp.maximum(conv, 0.0)
    flat = act.reshape(B, OC * D)
    return flat @ fc_w.T + fc_b[None, :]


if __name__ == "__main__":
    # Small shapes consistent with the module:
    #   input_dim D = 32, input_seq_len L = 8, in_channels = 1, out_channels OC = 4
    B, L, D, OC = 2, 8, 32, 4
    gain = 1.414

    key = jax.random.PRNGKey(0)
    k_x, k_cw, k_cb, k_fw, k_fb, k_x2 = jax.random.split(key, 6)

    x = jax.random.normal(k_x, (B, L, D), jnp.float32)

    # Conv2d(1, OC, (1, L)) weight: (OC, 1, 1, L); xavier_uniform_, gain=1.414
    conv_w = xavier_uniform(k_cw, (OC, 1, 1, L), fan_in=1 * 1 * L,
                            fan_out=OC * 1 * L, gain=gain)
    # Conv bias default init: U(-1/sqrt(fan_in), 1/sqrt(fan_in)), fan_in = L
    conv_b = jax.random.uniform(k_cb, (OC,), jnp.float32,
                                -1.0 / math.sqrt(L), 1.0 / math.sqrt(L))
    # Linear(OC*D, 1) weight: (1, OC*D); xavier_uniform_, gain=1.414
    fc_w = xavier_uniform(k_fw, (1, OC * D), fan_in=OC * D, fan_out=1, gain=gain)
    fc_b = jax.random.uniform(k_fb, (1,), jnp.float32,
                              -1.0 / math.sqrt(OC * D), 1.0 / math.sqrt(OC * D))

    # One-time weight folding (hoisted out of the per-call forward).
    params_bf16 = prepare_convkb_params(conv_w, conv_b, fc_w, fc_b,
                                        compute_dtype=jnp.bfloat16)
    params_f32 = prepare_convkb_params(conv_w, conv_b, fc_w, fc_b,
                                       compute_dtype=jnp.float32)

    # --- small-shape checks (single ragged tile: bt=8 > B=2) -----------------
    ref = reference_forward(x, conv_w, conv_b, fc_w, fc_b)

    out_f32 = jax.block_until_ready(convkb_forward(x, params_f32))
    assert out_f32.shape == (B, 1), out_f32.shape
    assert jnp.allclose(out_f32, ref, atol=1e-4, rtol=1e-4), (out_f32, ref)

    out_bf16 = jax.block_until_ready(convkb_forward(x, params_bf16))
    assert out_bf16.shape == (B, 1), out_bf16.shape
    assert jnp.allclose(out_bf16, ref, atol=5e-2, rtol=5e-2), (out_bf16, ref)

    # --- multi-tile + ragged last tile (3000 = 2*1024 + 952) -----------------
    B2 = 3000
    x_big = jax.random.normal(k_x2, (B2, L, D), jnp.float32)
    ref_big = reference_forward(x_big, conv_w, conv_b, fc_w, fc_b)

    out_big = jax.block_until_ready(
        convkb_forward(x_big, params_bf16, batch_tile=1024))
    assert out_big.shape == (B2, 1), out_big.shape
    assert jnp.allclose(out_big, ref_big, atol=5e-2, rtol=5e-2)

    # --- default (large-tile) config -----------------------------------------
    out_big2 = jax.block_until_ready(convkb_forward(x_big, params_bf16))
    assert out_big2.shape == (B2, 1), out_big2.shape
    assert jnp.allclose(out_big2, ref_big, atol=5e-2, rtol=5e-2)

    print("KERNEL_OK")
</pallas_src>

<mosaic_0001>
module attributes {stable_mosaic.version = 11 : i64} {
  func.func @convkb_kernel(%arg0: i32, %arg1: memref<8x256xf32, #tpu.memory_space<vmem>>, %arg2: memref<256x128xf32, #tpu.memory_space<vmem>>, %arg3: memref<1x128xf32, #tpu.memory_space<vmem>>, %arg4: memref<128x1xf32, #tpu.memory_space<vmem>>, %arg5: memref<1xf32, #tpu.memory_space<smem>>, %arg6: memref<8x1xf32, #tpu.memory_space<vmem>>) attributes {dimension_semantics = [#tpu.dimension_semantics<parallel>], iteration_bounds = array<i64: 1>, scalar_prefetch = 0 : i64, scratch_operands = 0 : i64, tpu.core_type = #tpu.core_type<tc>, window_params = [{transform_indices = @transform_0, window_bounds = array<i64: 8, 256>}, {pipeline_mode = #tpu.pipeline_mode<synchronous>, transform_indices = @transform_1, window_bounds = array<i64: 256, 128>}, {pipeline_mode = #tpu.pipeline_mode<synchronous>, transform_indices = @transform_2, window_bounds = array<i64: 1, 128>}, {pipeline_mode = #tpu.pipeline_mode<synchronous>, transform_indices = @transform_3, window_bounds = array<i64: 128, 1>}, {transform_indices = @transform_4, window_bounds = array<i64: 1>}, {transform_indices = @transform_5, window_bounds = array<i64: 8, 1>}]} {
    %c0 = arith.constant 0 : index
    %c0_0 = arith.constant 0 : index
    %0 = vector.load %arg1[%c0, %c0_0] : memref<8x256xf32, #tpu.memory_space<vmem>>, vector<8x256xf32>
    %c0_1 = arith.constant 0 : index
    %c0_2 = arith.constant 0 : index
    %1 = vector.load %arg2[%c0_1, %c0_2] : memref<256x128xf32, #tpu.memory_space<vmem>>, vector<256x128xf32>
    %cst = arith.constant dense<0.000000e+00> : vector<8x128xf32>
    %2 = tpu.matmul %0, %1, %cst {dimension_numbers = #tpu.dot_dimension_numbers<[1], [0], [0], [1], [0, 0, 1, 1], [], []>} : vector<8x256xf32>, vector<256x128xf32>, vector<8x128xf32> -> vector<8x128xf32>
    %c0_3 = arith.constant 0 : index
    %c0_4 = arith.constant 0 : index
    %3 = vector.load %arg3[%c0_3, %c0_4] : memref<1x128xf32, #tpu.memory_space<vmem>>, vector<1x128xf32>
    %4 = vector.broadcast %3 : vector<1x128xf32> to vector<8x128xf32>
    %5 = arith.addf %2, %4 : vector<8x128xf32>
    %cst_5 = arith.constant 0.000000e+00 : f32
    %6 = vector.broadcast %cst_5 : f32 to vector<8x128xf32>
    %7 = arith.maximumf %5, %6 : vector<8x128xf32>
    %c0_6 = arith.constant 0 : index
    %c0_7 = arith.constant 0 : index
    %8 = vector.load %arg4[%c0_6, %c0_7] : memref<128x1xf32, #tpu.memory_space<vmem>>, vector<128x1xf32>
    %cst_8 = arith.constant dense<0.000000e+00> : vector<8x1xf32>
    %9 = tpu.matmul %7, %8, %cst_8 {dimension_numbers = #tpu.dot_dimension_numbers<[1], [0], [0], [1], [0, 0, 1, 1], [], []>} : vector<8x128xf32>, vector<128x1xf32>, vector<8x1xf32> -> vector<8x1xf32>
    %c0_9 = arith.constant 0 : index
    %10 = memref.load %arg5[%c0_9] : memref<1xf32, #tpu.memory_space<smem>>
    %11 = vector.broadcast %10 : f32 to vector<8x1xf32>
    %12 = arith.addf %9, %11 : vector<8x1xf32>
    %c0_10 = arith.constant 0 : index
    %c0_11 = arith.constant 0 : index
    %13 = vector.load %arg6[%c0_10, %c0_11] : memref<8x1xf32, #tpu.memory_space<vmem>>, vector<8x1xf32>
    tpu.vector_store %arg6[%c0_10, %c0_11], %12 {strides = array<i32>} : memref<8x1xf32, #tpu.memory_space<vmem>>, vector<8x1xf32>,
    return
  }
  func.func @transform_0(%arg0: i32) -> (i32, i32) {
    %c0_i32 = arith.constant 0 : i32
    %c0_i32_0 = arith.constant 0 : i32
    return %arg0, %c0_i32 : i32, i32
  }
  func.func @transform_1(%arg0: i32) -> (i32, i32) {
    %c0_i32 = arith.constant 0 : i32
    %c0_i32_0 = arith.constant 0 : i32
    %c0_i32_1 = arith.constant 0 : i32
    return %c0_i32, %c0_i32_0 : i32, i32
  }
  func.func @transform_2(%arg0: i32) -> (i32, i32) {
    %c0_i32 = arith.constant 0 : i32
    %c0_i32_0 = arith.constant 0 : i32
    %c0_i32_1 = arith.constant 0 : i32
    return %c0_i32, %c0_i32_0 : i32, i32
  }
  func.func @transform_3(%arg0: i32) -> (i32, i32) {
    %c0_i32 = arith.constant 0 : i32
    %c0_i32_0 = arith.constant 0 : i32
    %c0_i32_1 = arith.constant 0 : i32
    return %c0_i32, %c0_i32_0 : i32, i32
  }
  func.func @transform_4(%arg0: i32) -> i32 {
    %c0_i32 = arith.constant 0 : i32
    %c0_i32_0 = arith.constant 0 : i32
    return %c0_i32 : i32
  }
  func.func @transform_5(%arg0: i32) -> (i32, i32) {
    %c0_i32 = arith.constant 0 : i32
    %c0_i32_0 = arith.constant 0 : i32
    return %arg0, %c0_i32 : i32, i32
  }
}

</mosaic_0001>

<bundles_post_ra>
// kernel: convkb_forward.1
= control target key start
LH: loop header
LB: loop body
LE: loop exit
PB: predicated region body
PF: predicated region fallthrough
CT: control target
= control target key end

     0   :  { %11 = vsyncpa [#allocation4], 0  ;;  %s245_s21 = smov [#allocation3]   ;;  %s246_s23 = smov 128   ;;  %s350_s0 = inlined_call_operand.vmem [shape: f32[2,256], index: 0, kind: input, shape index: {}]   ;;  %s351_s1 = inlined_call_operand.hbm [shape: f32[256,128], index: 1, kind: input, shape index: {}]   ;;  %s352_s2 = inlined_call_operand.vmem [shape: f32[1,128], index: 2, kind: input, shape index: {}]   ;;  %s353_s3 = inlined_call_operand.vmem [shape: f32[128,1], index: 3, kind: input, shape index: {}]   ;;  %s354_s4 = inlined_call_operand.<no memory space> [shape: f32[1], index: 4, kind: input, shape index: {}]   ;;  %s355_s5 = inlined_call_operand.vmem [shape: f32[2,1], index: 5, kind: output, shape index: {}]  }
   0x1   :  { %s18_s20 = sshll.u32 %s351_s1, 4  ;;  %s20_s22 = sshll.u32 %s245_s21, 4  ;;  %s19_s20 = int_to_ptr.hbm [resolvable:$true] %s18_s20  ;;  %s21_s22 = int_to_ptr.vmem [resolvable:$true] %s20_s22 }
   0x2   :  { %s247_s24 = smov 8  }
   0x3   :  { %26 = dma.hbm_to_vmem [thread:$0]  %s19_s20, 4096, %s21_s22, [#allocation4], %s246_s23, %s246_s23, %s247_s24  }
   0x4   :  { %243 = dma.done.wait [#allocation4], 4096  }
   0x5   :  { %244 = vsyncadd [#allocation4], 4294963200  ;;  %v56_v0 = vld [vmem:[#allocation3 + $0x78] sm:$0xff]  ;;  %v55_v1 = vld [vmem:[#allocation3 + $0x70] sm:$0xff]  ;;  %v150_v60 = vstv %s354_s4  ;;  %vm171_vm0 = vcmask 7168  }
   0x6   :  { %v72_v2 = vld [vmem:[#allocation3 + $0xf8] sm:$0xff]  ;;  %92 = vmatpush.msra.mxu0 %v56_v0  ;;  %v71_v3 = vld [vmem:[#allocation3 + $0xf0] sm:$0xff]  ;;  %v54_v4 = vld [vmem:[#allocation3 + $0x68] sm:$0xff] }
   0x7   :  { %112 = vmatpush.msra.mxu1 %v72_v2  ;;  %v70_v5 = vld [vmem:[#allocation3 + $0xe8] sm:$0xff]  ;;  %v53_v6 = vld [vmem:[#allocation3 + $0x60] sm:$0xff]  ;;  %v52_v8 = vld [vmem:[#allocation3 + $0x58] sm:$0xff] }
   0x8   :  { %93 = vmatpush.msra.mxu0 %v55_v1  ;;  %v69_v7 = vld [vmem:[#allocation3 + $0xe0] sm:$0xff]  ;;  %v68_v9 = vld [vmem:[#allocation3 + $0xd8] sm:$0xff]  ;;  %v51_v10 = vld [vmem:[#allocation3 + $0x50] sm:$0xff] }
   0x9   :  { %113 = vmatpush.msra.mxu1 %v71_v3  ;;  %v67_v11 = vld [vmem:[#allocation3 + $0xd0] sm:$0xff]  ;;  %v50_v12 = vld [vmem:[#allocation3 + $0x48] sm:$0xff]  ;;  %v37_v14 = vld [vmem:[%s350_s0] sm:$0xf] }
   0xa   :  { %94 = vmatpush.msra.mxu0 %v54_v4  ;;  %v66_v13 = vld [vmem:[#allocation3 + $0xc8] sm:$0xff]  ;;  %v38_v15 = vld [vmem:[%s350_s0 + $0x4] sm:$0xf]  ;;  %v39_v16 = vld [vmem:[%s350_s0 + $0x8] sm:$0xf] }
   0xb   :  { %114 = vmatpush.msra.mxu1 %v70_v5  ;;  %v40_v17 = vld [vmem:[%s350_s0 + $0xc] sm:$0xf]  ;;  %81 = vst [vmem:[#allocation1] ss:$4 sm:$0xff] %v37_v14  ;;  %v148_v20 = vld [vmem:[%s353_s3 + $0x78] sm:$0xff]  ;;  %v147_v21 = vld [vmem:[%s353_s3 + $0x70] sm:$0xff] }
   0xc   :  { %95 = vmatpush.msra.mxu0 %v53_v6  ;;  %v49_v18 = vld [vmem:[#allocation3 + $0x40] sm:$0xff]  ;;  %83 = vst [vmem:[#allocation1 + $0x1] ss:$4 sm:$0xff] %v38_v15  ;;  %v48_v22 = vld [vmem:[#allocation3 + $0x38] sm:$0xff]  ;;  %151 = vmatpush.msra.mxu2 %v148_v20  ;;  %v47_v25 = vld [vmem:[#allocation3 + $0x30] sm:$0xff] }
   0xd   :  { %115 = vmatpush.msra.mxu1 %v69_v7  ;;  %v65_v19 = vld [vmem:[#allocation3 + $0xc0] sm:$0xff]  ;;  %85 = vst [vmem:[#allocation1 + $0x2] ss:$4 sm:$0xff] %v39_v16  ;;  %v64_v23 = vld [vmem:[#allocation3 + $0xb8] sm:$0xff]  ;;  %v63_v26 = vld [vmem:[#allocation3 + $0xb0] sm:$0xff] }
   0xe   :  { %96 = vmatpush.msra.mxu0 %v52_v8  ;;  %87 = vst [vmem:[#allocation1 + $0x3] ss:$4 sm:$0xff] %v40_v17  ;;  %v146_v24 = vld [vmem:[%s353_s3 + $0x68] sm:$0xff]  ;;  %152 = vmatpush.msra.mxu2 %v147_v21  ;;  %v145_v27 = vld [vmem:[%s353_s3 + $0x60] sm:$0xff]  ;;  %v46_v28 = vld [vmem:[#allocation3 + $0x28] sm:$0xff] }
   0xf   :  { %116 = vmatpush.msra.mxu1 %v68_v9  ;;  %v62_v29 = vld [vmem:[#allocation3 + $0xa8] sm:$0xff]  ;;  %v144_v30 = vld [vmem:[%s353_s3 + $0x58] sm:$0xff]  ;;  %v45_v31 = vld [vmem:[#allocation3 + $0x20] sm:$0xff] }
  0x10   :  { %97 = vmatpush.msra.mxu0 %v51_v10  ;;  %153 = vmatpush.msra.mxu2 %v146_v24  ;;  %v61_v32 = vld [vmem:[#allocation3 + $0xa0] sm:$0xff]  ;;  %v143_v33 = vld [vmem:[%s353_s3 + $0x50] sm:$0xff]  ;;  %v44_v34 = vld [vmem:[#allocation3 + $0x18] sm:$0xff] }
  0x11   :  { %117 = vmatpush.msra.mxu1 %v67_v11  ;;  %v60_v35 = vld [vmem:[#allocation3 + $0x98] sm:$0xff]  ;;  %v142_v36 = vld [vmem:[%s353_s3 + $0x48] sm:$0xff]  ;;  %v43_v37 = vld [vmem:[#allocation3 + $0x10] sm:$0xff] }
  0x12   :  { %98 = vmatpush.msra.mxu0 %v50_v12  ;;  %154 = vmatpush.msra.mxu2 %v145_v27  ;;  %v59_v38 = vld [vmem:[#allocation3 + $0x90] sm:$0xff]  ;;  %v141_v39 = vld [vmem:[%s353_s3 + $0x40] sm:$0xff]  ;;  %v42_v40 = vld [vmem:[#allocation3 + $0x8] sm:$0xff] }
  0x13   :  { %118 = vmatpush.msra.mxu1 %v66_v13  ;;  %v58_v41 = vld [vmem:[#allocation3 + $0x88] sm:$0xff]  ;;  %v140_v42 = vld [vmem:[%s353_s3 + $0x38] sm:$0xff]  ;;  %v41_v43 = vld [vmem:[#allocation3] sm:$0xff] }
  0x14   :  { %99 = vmatpush.msra.mxu0 %v49_v18  ;;  %155 = vmatpush.msra.mxu2 %v144_v30  ;;  %v57_v44 = vld [vmem:[#allocation3 + $0x80] sm:$0xff]  ;;  %v139_v47 = vld [vmem:[%s353_s3 + $0x30] sm:$0xff]  ;;  %v137_v49 = vld [vmem:[%s353_s3 + $0x20] sm:$0xff] }
  0x15   :  { %119 = vmatpush.msra.mxu1 %v65_v19  ;;  %v88_v45 = vld.sshfl [vmem:[#allocation1] sm:$0xff pattern:$0x73625140]  ;;  %v89_v46 = vld.sshfl [vmem:[#allocation1 + $0x8] sm:$0xff pattern:$0x73625140] }
  0x16   :  { %100 = vmatpush.msra.mxu0 %v48_v22  ;;  %156 = vmatpush.msra.mxu2 %v143_v33  ;;  %v138_v48 = vld [vmem:[%s353_s3 + $0x28] sm:$0xff]  ;;  %v136_v50 = vld [vmem:[%s353_s3 + $0x18] sm:$0xff]  ;;  %v135_v51 = vld [vmem:[%s353_s3 + $0x10] sm:$0xff] }
  0x17   :  { %120 = vmatpush.msra.mxu1 %v64_v23  ;;  %v134_v52 = vld [vmem:[%s353_s3 + $0x8] sm:$0xff]  ;;  %v133_v53 = vld [vmem:[%s353_s3] sm:$0xff] }
  0x18   :  { %101 = vmatpush.msra.mxu0 %v47_v25  ;;  %157 = vmatpush.msra.mxu2 %v142_v36  ;;  %v218_v54 = vld [vmem:[%s352_s2] ss:$0 sm:$0xff] }
  0x19   :  { %121 = vmatpush.msra.mxu1 %v63_v26 }
  0x1a   :  { %102 = vmatpush.msra.mxu0 %v46_v28  ;;  %158 = vmatpush.msra.mxu2 %v141_v39 }
  0x1b   :  { %122 = vmatpush.msra.mxu1 %v62_v29 }
  0x1c   :  { %103 = vmatpush.msra.mxu0 %v45_v31  ;;  %159 = vmatpush.msra.mxu2 %v140_v42 }
  0x1d   :  { %123 = vmatpush.msra.mxu1 %v61_v32 }
  0x1e   :  { %104 = vmatpush.msra.mxu0 %v44_v34  ;;  %160 = vmatpush.msra.mxu2 %v139_v47 }
  0x1f   :  { %124 = vmatpush.msra.mxu1 %v60_v35 }
  0x20   :  { %105 = vmatpush.msra.mxu0 %v43_v37  ;;  %161 = vmatpush.msra.mxu2 %v138_v48 }
  0x21   :  { %125 = vmatpush.msra.mxu1 %v59_v38 }
  0x22   :  { %106 = vmatpush.msra.mxu0 %v42_v40  ;;  %162 = vmatpush.msra.mxu2 %v137_v49 }
  0x23   :  { %126 = vmatpush.msra.mxu1 %v58_v41 }
  0x24   :  { %107 = vmatpush.msra.mxu0 %v41_v43  ;;  %163 = vmatpush.msra.mxu2 %v136_v50 }
  0x25   :  { %127 = vmatpush.msra.mxu1 %v57_v44  ;;  %108 = vmatmul.f32.vlgmr.msra.gmra.mxu0 %v88_v45 }
  0x26   :  { %128 = vmatmul.f32.vlgmr.msra.gmra.mxu1 %v89_v46  ;;  %164 = vmatpush.msra.mxu2 %v135_v51 }
  0x28   :  { %165 = vmatpush.msra.mxu2 %v134_v52 }
  0x2a   :  { %166 = vmatpush.msra.mxu2 %v133_v53 }
  0xa2   :  { %v109_v55 = vpop.f32.mrf.mxu0 }
  0xa3   :  { %v129_v56 = vpop.f32.mrf.mxu1  ;;  %v110_v57 = vadd.f32 %v218_v54, %v109_v55 }
  0xa5   :  { %v130_v58 = vadd.f32 %v129_v56, %v110_v57 }
  0xa7   :  { %v132_v59 = vmax.f32 %v130_v58, 0.0 }
  0xa9   :  { %167 = vmatmul.f32.vlgmr.msra.gmra.mxu2 %v132_v59 }
 0x12c   :  { %v168_v61 = vpop.f32.mrf.mxu2 }
 0x12d   :  { %v169_v62 = vadd.f32 %v168_v61, %v150_v60 }
 0x12f   :  { %172 = vst.msk [vmem:[#allocation5] sm:$0xff] %vm171_vm0, %v169_v62 }
 0x136   :  { %v191_v63 = vld [vmem:[#allocation5] sm:$0x3] }
 0x137   :  { %192 = vst [vmem:[%s355_s5] sm:$0x3] %v191_v63 }
 0x138   :  { %210 = vsyncpa [#allocation4], 1 }

</bundles_post_ra>
